<compile_context>
chip_gen: v7x
topology: tpu7x:2x2x1
jax: 0.10.0
libtpu: 0.0.40
codegen_flags: <defaults>
</compile_context>

<pallas_src>
import math
from functools import partial

import jax
import jax.numpy as jnp
from jax import lax
from jax.experimental import pallas as pl
from jax.experimental.pallas import tpu as pltpu


def _embed_gather_kernel(ids_ref, emb_hbm, out_ref, buf, sem, *,
                         t_blk, vocab_size, scale):
    # ids_ref : SMEM (num_tokens_padded,) int32  -- scalar-prefetched token ids
    # emb_hbm : HBM  (vocab_size, d_model) f32   -- raw HBM ref (memory_space=pl.ANY)
    # out_ref : VMEM (t_blk, d_model) f32        -- pipelined output block
    # buf     : VMEM (t_blk, d_model) f32        -- DMA landing buffer
    # sem     : DMA semaphores, one per in-flight row copy
    base = pl.program_id(0) * t_blk

    def issue(t, carry):
        row = ids_ref[base + t]
        # nn.Embedding raises on out-of-range ids; we clamp to a valid row so the DMA
        # address is always in-bounds (defined behavior instead of an OOB read).
        row = jnp.minimum(jnp.maximum(row, 0), vocab_size - 1)
        pltpu.make_async_copy(
            emb_hbm.at[pl.ds(row, 1), :],
            buf.at[pl.ds(t, 1), :],
            sem.at[t],
        ).start()
        return carry

    lax.fori_loop(0, t_blk, issue, 0)

    def wait(t, carry):
        pltpu.make_async_copy(
            emb_hbm.at[pl.ds(0, 1), :],      # dummy src; wait keys off dst + sem
            buf.at[pl.ds(t, 1), :],
            sem.at[t],
        ).wait()
        return carry

    lax.fori_loop(0, t_blk, wait, 0)

    # Single dense (t_blk, d_model) scale + store -> unmasked lane-dense vst.
    out_ref[...] = buf[...] * scale


def input_embeddings(x, embedding_table, *, t_blk=32):
    """x: (batch, seq) int token ids; embedding_table: (vocab, d_model) f32.
    Returns (batch, seq, d_model) f32 == embedding(x) * sqrt(d_model)."""
    batch, seq = x.shape
    vocab_size, d_model = embedding_table.shape
    num_tokens = batch * seq

    # Token-block size: multiple of 8 (sublane), no larger than the (8-padded) token count.
    t_blk = min(t_blk, pl.cdiv(num_tokens, 8) * 8)
    t_blk = max(8, (t_blk // 8) * 8)

    num_blocks = pl.cdiv(num_tokens, t_blk)
    padded = num_blocks * t_blk

    ids_flat = x.reshape(num_tokens).astype(jnp.int32)
    if padded != num_tokens:
        ids_flat = jnp.pad(ids_flat, (0, padded - num_tokens))  # pad with row 0 (discarded)

    scale = float(math.sqrt(d_model))

    kernel = partial(_embed_gather_kernel,
                     t_blk=t_blk, vocab_size=vocab_size, scale=scale)

    out_flat = pl.pallas_call(
        kernel,
        out_shape=jax.ShapeDtypeStruct((padded, d_model), jnp.float32),
        grid_spec=pltpu.PrefetchScalarGridSpec(
            num_scalar_prefetch=1,                      # ids -> SMEM
            grid=(num_blocks,),
            in_specs=[
                pl.BlockSpec(memory_space=pl.ANY),      # embedding table stays in HBM
            ],
            out_specs=pl.BlockSpec((t_blk, d_model), lambda i, ids: (i, 0)),
            scratch_shapes=[
                pltpu.VMEM((t_blk, d_model), jnp.float32),
                pltpu.SemaphoreType.DMA((t_blk,)),
            ],
        ),
        compiler_params=pltpu.CompilerParams(
            dimension_semantics=("parallel",)),          # token-block axis shards across TCs (v7x)
    )(ids_flat, embedding_table)

    return out_flat[:num_tokens].reshape(batch, seq, d_model)


if __name__ == "__main__":
    # Small, deterministic setup consistent with the module's forward.
    batch, seq = 2, 8
    vocab_size, d_model = 256, 128

    key = jax.random.PRNGKey(0)
    k_emb, k_ids = jax.random.split(key)

    # nn.Embedding default init ~ N(0, 1)
    embedding_table = jax.random.normal(k_emb, (vocab_size, d_model), dtype=jnp.float32)
    x = jax.random.randint(k_ids, (batch, seq), minval=0, maxval=vocab_size, dtype=jnp.int32)

    out = input_embeddings(x, embedding_table)
    out = jax.block_until_ready(out)

    # Reference check (plain JAX gather + scale)
    ref = embedding_table[x] * math.sqrt(d_model)
    assert out.shape == (batch, seq, d_model)
    assert jnp.allclose(out, ref, atol=1e-5, rtol=1e-5)

    print("KERNEL_OK")
</pallas_src>

<mosaic_0001>
module attributes {stable_mosaic.version = 11 : i64} {
  func.func @_embed_gather_kernel(%arg0: i32, %arg1: memref<16xi32, #tpu.memory_space<smem>>, %arg2: memref<256x128xf32, #tpu.memory_space<any>>, %arg3: memref<16x128xf32, #tpu.memory_space<vmem>>, %arg4: memref<16x128xf32, #tpu.memory_space<vmem>>, %arg5: memref<16x!tpu.dma_semaphore, #tpu.memory_space<semaphore_mem>>) attributes {dimension_semantics = [#tpu.dimension_semantics<parallel>], iteration_bounds = array<i64: 1>, scalar_prefetch = 1 : i64, scratch_operands = 2 : i64, tpu.core_type = #tpu.core_type<tc>, window_params = [{}, {transform_indices = @transform_1, window_bounds = array<i64: 16, 128>}]} {
    %c16_i32 = arith.constant 16 : i32
    %0 = arith.muli %arg0, %c16_i32 : i32
    %c0_i32 = arith.constant 0 : i32
    %c16_i32_0 = arith.constant 16 : i32
    %1 = arith.addi %c0_i32, %c16_i32_0 : i32
    %c1_i32 = arith.constant 1 : i32
    scf.for %arg6 = %c0_i32 to %1 step %c1_i32  : i32 {
      %7 = arith.addi %0, %arg6 : i32
      %8 = arith.index_cast %7 : i32 to index
      %9 = memref.load %arg1[%8] : memref<16xi32, #tpu.memory_space<smem>>
      %c0_i32_9 = arith.constant 0 : i32
      %10 = arith.maxsi %9, %c0_i32_9 : i32
      %c255_i32 = arith.constant 255 : i32
      %11 = arith.minsi %10, %c255_i32 : i32
      %c0_i32_10 = arith.constant 0 : i32
      %12 = tpu.memref_slice %arg2[%11, %c0_i32_10] : memref<256x128xf32, #tpu.memory_space<any>> -> memref<1x128xf32, #tpu.memory_space<any>>
      %c0_i32_11 = arith.constant 0 : i32
      %13 = tpu.memref_slice %arg4[%arg6, %c0_i32_11] : memref<16x128xf32, #tpu.memory_space<vmem>> -> memref<1x128xf32, #tpu.memory_space<vmem>>
      %14 = tpu.memref_slice %arg5[%arg6] : memref<16x!tpu.dma_semaphore, #tpu.memory_space<semaphore_mem>> -> memref<1x!tpu.dma_semaphore, #tpu.memory_space<semaphore_mem>>
      %15 = tpu.memref_squeeze %14 : memref<1x!tpu.dma_semaphore, #tpu.memory_space<semaphore_mem>> -> memref<!tpu.dma_semaphore, #tpu.memory_space<semaphore_mem>>
      tpu.enqueue_dma source(%12 : memref<1x128xf32, #tpu.memory_space<any>>) target(%13 : memref<1x128xf32, #tpu.memory_space<vmem>>) target_semaphore(%15 : memref<!tpu.dma_semaphore, #tpu.memory_space<semaphore_mem>>)
    }
    %c16_i32_1 = arith.constant 16 : i32
    %c0_i32_2 = arith.constant 0 : i32
    %c16_i32_3 = arith.constant 16 : i32
    %2 = arith.addi %c0_i32_2, %c16_i32_3 : i32
    %c1_i32_4 = arith.constant 1 : i32
    scf.for %arg6 = %c0_i32_2 to %2 step %c1_i32_4  : i32 {
      %c0_i32_9 = arith.constant 0 : i32
      %c0_i32_10 = arith.constant 0 : i32
      %7 = tpu.memref_slice %arg2[%c0_i32_9, %c0_i32_10] : memref<256x128xf32, #tpu.memory_space<any>> -> memref<1x128xf32, #tpu.memory_space<any>>
      %c0_i32_11 = arith.constant 0 : i32
      %8 = tpu.memref_slice %arg4[%arg6, %c0_i32_11] : memref<16x128xf32, #tpu.memory_space<vmem>> -> memref<1x128xf32, #tpu.memory_space<vmem>>
      %9 = tpu.memref_slice %arg5[%arg6] : memref<16x!tpu.dma_semaphore, #tpu.memory_space<semaphore_mem>> -> memref<1x!tpu.dma_semaphore, #tpu.memory_space<semaphore_mem>>
      %10 = tpu.memref_squeeze %9 : memref<1x!tpu.dma_semaphore, #tpu.memory_space<semaphore_mem>> -> memref<!tpu.dma_semaphore, #tpu.memory_space<semaphore_mem>>
      tpu.wait_dma2 semaphore(%10 : memref<!tpu.dma_semaphore, #tpu.memory_space<semaphore_mem>>) src(%7 : memref<1x128xf32, #tpu.memory_space<any>>) dst(%8 : memref<1x128xf32, #tpu.memory_space<vmem>>)
    }
    %c16_i32_5 = arith.constant 16 : i32
    %c0 = arith.constant 0 : index
    %c0_6 = arith.constant 0 : index
    %3 = vector.load %arg4[%c0, %c0_6] : memref<16x128xf32, #tpu.memory_space<vmem>>, vector<16x128xf32>
    %cst = arith.constant 11.3137083 : f32
    %4 = vector.broadcast %cst : f32 to vector<16x128xf32>
    %5 = arith.mulf %3, %4 : vector<16x128xf32>
    %c0_7 = arith.constant 0 : index
    %c0_8 = arith.constant 0 : index
    %6 = vector.load %arg3[%c0_7, %c0_8] : memref<16x128xf32, #tpu.memory_space<vmem>>, vector<16x128xf32>
    tpu.vector_store %arg3[%c0_7, %c0_8], %5 {strides = array<i32>} : memref<16x128xf32, #tpu.memory_space<vmem>>, vector<16x128xf32>,
    return
  }
  func.func @transform_1(%arg0: i32, %arg1: memref<16xi32, #tpu.memory_space<smem>>) -> (i32, i32) {
    %c0_i32 = arith.constant 0 : i32
    %c0_i32_0 = arith.constant 0 : i32
    return %arg0, %c0_i32 : i32, i32
  }
}

</mosaic_0001>

<bundles_post_ra>
// kernel: tpu_custom_call.1
= control target key start
LH: loop header
LB: loop body
LE: loop exit
PB: predicated region body
PF: predicated region fallthrough
CT: control target
= control target key end

     0   :  { %s384_s0 = inlined_call_operand.hbm [shape: s32[16], index: 0, kind: input, shape index: {}]   ;;  %s385_s1 = inlined_call_operand.hbm [shape: f32[256,128], index: 1, kind: input, shape index: {}]   ;;  %s386_s2 = inlined_call_operand.hbm [shape: f32[16,128], index: 2, kind: output, shape index: {}]  }
   0x1   :  { %s242_s11 = scalar_lea.hbm %s384_s0, 16 }
   0x2   :  { %p243_p0 = scmp.ne.s32.totalorder %s384_s0, %s242_s11  ;;  %p246_p1 = scmp.lt.u32.totalorder %s242_s11, %s384_s0 }
   0x4   :  { %p248_p2 = pnand %p246_p1, %p243_p0 }
   0x6   :  { %251 = shalt.err (!%p248_p2)  }
   0x7   :  { %s320_s16 = smov [#allocation5]  }
   0x8   :  { %8 = dma.hbm_to_smem %s384_s0, 16, %s320_s16, [#allocation4] }
   0x9   :  { %306 = dma.done.wait [#allocation4], 16 }
   0xa   :  { %307 = vsyncadd [#allocation4], 4294967280 }
   0xb   :  { %10 = sfence }
   0xc   :  { %11 = vsyncpa [#allocation7], 0  ;;  %s352_s19 = smov 0  }
   0xd LB: > { %s20_s20 = sld [smem:[#allocation5 + %s314_s19]]  ;;  %s27_s21 = scalar_lea.vmem [#allocation2], %s314_s19  ;;  %s314_s19 = sphi %s352_s19, %s18_s19  }
   0xe   : > { %s36_s22 = sshll.u32 %s27_s21, 4  ;;  %s28_s26 = scalar_lea.sflag [#allocation3], %s314_s19  ;;  %s37_s22 = int_to_ptr.vmem [resolvable:$true] %s36_s22 }
   0xf   : > { %s254_s30 = scalar_lea.hbm %s385_s1, 4096 }
  0x13   : > { %p21_p3 = scmp.gt.s32.totalorder %s20_s20, 0  ;;  %p198_p4 = scmp.lt.s32.totalorder %s20_s20, 255 }
  0x15   : > { %s388_s20 = smov (!%p21_p3, %s20_s20), 0 }
  0x16   : > { %s390_s20 = smov (!%p198_p4, %s388_s20), 255 }
  0x17   : > { %s203_s0 = sshll.u32 %s390_s20, 4 }
  0x18   : > { %s26_s25 = scalar_lea.hbm %s385_s1, %s203_s0 }
  0x19   : > { %s252_s27 = scalar_lea.hbm %s26_s25, 16  ;;  %p255_p6 = scmp.lt.u32.totalorder %s26_s25, %s385_s1 }
  0x1a   : > { %p253_p5 = scmp.ne.s32.totalorder %s26_s25, %s252_s27  ;;  %p256_p7 = scmp.lt.u32.totalorder %s254_s30, %s252_s27 }
  0x1b   : > { %p258_p9 = scmp.lt.u32.totalorder %s252_s27, %s26_s25 }
  0x1c   : > { %p257_p8 = por %p256_p7, %p255_p6 }
  0x1e   : > { %p259_p10 = por %p258_p9, %p257_p8 }
  0x20   : > { %p260_p11 = pnand %p259_p10, %p253_p5 }
  0x22   : > { %263 = shalt.err (!%p260_p11)  }
  0x23   : > { %s264_s5 = scalar_lea.vmem %s37_s22, 16  ;;  %s321_s6 = smov [#allocation2]  }
  0x24   : > { %p265_p12 = scmp.ne.s32.totalorder %s37_s22, %s264_s5  ;;  %s266_s7 = sshll.u32 %s321_s6, 4  ;;  %s267_s7 = int_to_ptr.vmem [resolvable:$false] %s266_s7 }
  0x25   : > { %s268_s8 = scalar_lea.vmem %s267_s7, 256  ;;  %p269_p13 = scmp.lt.s32.totalorder %s37_s22, %s267_s7 }
  0x26   : > { %p270_p0 = scmp.lt.s32.totalorder %s268_s8, %s264_s5 }
  0x28   : > { %p271_p1 = por %p270_p0, %p269_p13 }
  0x2a   : > { %p272_p2 = pnand %p271_p1, %p265_p12 }
  0x2c   : > { %275 = shalt.err (!%p272_p2)  }
  0x2d   : > { %39 = dma.hbm_to_vmem [thread:$0]  %s26_s25, 16, %s37_s22, %s28_s26 }
  0x2e   : > { %s18_s19 = sadd.s32 1, %s314_s19  }
  0x2f   : > { %p15_p3 = scmp.ge.s32.totalorder %s18_s19, 16  }
  0x30   :  { %s316_s9 = smov (%p15_p3), 0  }
  0x31   :  { %17 = sbr.rel (!%p15_p3) target bundleno = 13 (0xd), region = 57 }
  0x38 LB: > { %s46_s10 = scalar_lea.sflag [#allocation3], %s318_s9  ;;  %s318_s9 = sphi %s316_s9, %s45_s9  }
  0x39   : > { %308 = dma.done.wait %s46_s10, 16 }
  0x3a   : > { %309 = vsyncadd %s46_s10, 4294967280  ;;  %s45_s9 = sadd.s32 1, %s318_s9  }
  0x3b   : > { %p42_p4 = scmp.ge.s32.totalorder %s45_s9, 16  }
  0x3c   :  { %v50_v0 = vld [vmem:[#allocation2] sm:$0xff] (%p42_p4)  ;;  %v51_v1 = vld [vmem:[#allocation2 + $0x8] sm:$0xff] (%p42_p4)  ;;  %s322_s11 = smov (%p42_p4), [#allocation6]  }
  0x3d   :  { %44 = sbr.rel (!%p42_p4) target bundleno = 56 (0x38), region = 68  ;;  %v52_v2 = vmul.f32 (%p42_p4), 11.313708, %v50_v0  ;;  %v53_v3 = vmul.f32 (%p42_p4), 11.313708, %v51_v1  ;;  %s61_s12 = sshll.u32 (%p42_p4), %s322_s11, 4  ;;  %s62_s12 = int_to_ptr.vmem [resolvable:$true] %s61_s12 }
  0x3e   :  { %s276_s1 = scalar_lea.vmem (%p42_p4), %s62_s12, 256  ;;  %p281_p6 = scmp.lt.s32.totalorder (%p42_p4), %s62_s12, %s62_s12 }
  0x3f   :  { %54 = vst [vmem:[#allocation6] sm:$0xff] (%p42_p4), %v52_v2  ;;  %55 = vst [vmem:[#allocation6 + $0x8] sm:$0xff] (%p42_p4), %v53_v3  ;;  %p277_p5 = scmp.ne.s32.totalorder (%p42_p4), %s62_s12, %s276_s1  ;;  %p282_p7 = scmp.lt.s32.totalorder (%p42_p4), %s276_s1, %s276_s1 }
  0x41   :  { %p283_p8 = por (%p42_p4), %p282_p7, %p281_p6 }
  0x43   :  { %p284_p9 = pnand (%p42_p4), %p283_p8, %p277_p5 }
  0x45   :  { %287 = shalt.err (!%p284_p9)
}
  0x46   :  { %s288_s15 = scalar_lea.hbm %s386_s2, 256 }
  0x47   :  { %p289_p10 = scmp.ne.s32.totalorder %s386_s2, %s288_s15  ;;  %p292_p11 = scmp.lt.u32.totalorder %s288_s15, %s386_s2 }
  0x49   :  { %p294_p12 = pnand %p292_p11, %p289_p10 }
  0x4b   :  { %297 = shalt.err (!%p294_p12)
}
  0x4c   :  { %s323_s20 = smov 128   ;;  %s324_s21 = smov 8  }
  0x4d   :  { %67 = dma.vmem_to_hbm [thread:$0]  %s62_s12, 256, %s386_s2, [#allocation7], %s323_s20, %s323_s20, %s324_s21  }
  0x4e   :  { %310 = dma.done.wait [#allocation7], 256  }
  0x4f   :  { %311 = vsyncadd [#allocation7], 4294967040 }
  0x50   :  { %71 = vsyncpa [#allocation7], 1 }
  0x51   :  { %72 = vsyncmov [#allocation3] }
  0x54   :  { %s73_s23 = vpop.sfrf %72 }
  0x55   :  { %p204_p13 = scmp.ne.s32.totalorder %s73_s23, 0 }
  0x57   :  { %77 = shalt.err (%p204_p13)  }
  0x58   :  { %79 = vsyncmov [#allocation3 + $0x1] }
  0x5b   :  { %s80_s24 = vpop.sfrf %79 }
  0x5c   :  { %p205_p0 = scmp.ne.s32.totalorder %s80_s24, 0 }
  0x5e   :  { %84 = shalt.err (%p205_p0)  }
  0x5f   :  { %86 = vsyncmov [#allocation3 + $0x2] }
  0x62   :  { %s87_s25 = vpop.sfrf %86 }
  0x63   :  { %p206_p1 = scmp.ne.s32.totalorder %s87_s25, 0 }
  0x65   :  { %91 = shalt.err (%p206_p1)  }
  0x66   :  { %93 = vsyncmov [#allocation3 + $0x3] }
  0x69   :  { %s94_s26 = vpop.sfrf %93 }
  0x6a   :  { %p207_p2 = scmp.ne.s32.totalorder %s94_s26, 0 }
  0x6c   :  { %98 = shalt.err (%p207_p2)  }
  0x6d   :  { %100 = vsyncmov [#allocation3 + $0x4] }
  0x70   :  { %s101_s2 = vpop.sfrf %100 }
  0x71   :  { %p208_p3 = scmp.ne.s32.totalorder %s101_s2, 0 }
  0x73   :  { %105 = shalt.err (%p208_p3)  }
  0x74   :  { %107 = vsyncmov [#allocation3 + $0x5] }
  0x77   :  { %s108_s27 = vpop.sfrf %107 }
  0x78   :  { %p209_p4 = scmp.ne.s32.totalorder %s108_s27, 0 }
  0x7a   :  { %112 = shalt.err (%p209_p4)  }
  0x7b   :  { %114 = vsyncmov [#allocation3 + $0x6] }
  0x7e   :  { %s115_s28 = vpop.sfrf %114 }
  0x7f   :  { %p210_p5 = scmp.ne.s32.totalorder %s115_s28, 0 }
  0x81   :  { %119 = shalt.err (%p210_p5)  }
  0x82   :  { %121 = vsyncmov [#allocation3 + $0x7] }
  0x85   :  { %s122_s29 = vpop.sfrf %121 }
  0x86   :  { %p211_p6 = scmp.ne.s32.totalorder %s122_s29, 0 }
  0x88   :  { %126 = shalt.err (%p211_p6)  }
  0x89   :  { %128 = vsyncmov [#allocation3 + $0x8] }
  0x8c   :  { %s129_s30 = vpop.sfrf %128 }
  0x8d   :  { %p212_p7 = scmp.ne.s32.totalorder %s129_s30, 0 }
  0x8f   :  { %133 = shalt.err (%p212_p7)  }
  0x90   :  { %135 = vsyncmov [#allocation3 + $0x9] }
  0x93   :  { %s136_s3 = vpop.sfrf %135 }
  0x94   :  { %p213_p8 = scmp.ne.s32.totalorder %s136_s3, 0 }
  0x96   :  { %140 = shalt.err (%p213_p8)  }
  0x97   :  { %142 = vsyncmov [#allocation3 + $0xa] }
  0x9a   :  { %s143_s4 = vpop.sfrf %142 }
  0x9b   :  { %p214_p9 = scmp.ne.s32.totalorder %s143_s4, 0 }
  0x9d   :  { %147 = shalt.err (%p214_p9)  }
  0x9e   :  { %149 = vsyncmov [#allocation3 + $0xb] }
  0xa1   :  { %s150_s5 = vpop.sfrf %149 }
  0xa2   :  { %p215_p10 = scmp.ne.s32.totalorder %s150_s5, 0 }
  0xa4   :  { %154 = shalt.err (%p215_p10)  }
  0xa5   :  { %156 = vsyncmov [#allocation3 + $0xc] }
  0xa8   :  { %s157_s6 = vpop.sfrf %156 }
  0xa9   :  { %p216_p11 = scmp.ne.s32.totalorder %s157_s6, 0 }
  0xab   :  { %161 = shalt.err (%p216_p11)  }
  0xac   :  { %163 = vsyncmov [#allocation3 + $0xd] }
  0xaf   :  { %s164_s7 = vpop.sfrf %163 }
  0xb0   :  { %p217_p12 = scmp.ne.s32.totalorder %s164_s7, 0 }
  0xb2   :  { %168 = shalt.err (%p217_p12)  }
  0xb3   :  { %170 = vsyncmov [#allocation3 + $0xe] }
  0xb6   :  { %s171_s8 = vpop.sfrf %170 }
  0xb7   :  { %p218_p13 = scmp.ne.s32.totalorder %s171_s8, 0 }
  0xb9   :  { %175 = shalt.err (%p218_p13)  }
  0xba   :  { %177 = vsyncmov [#allocation3 + $0xf] }
  0xbd   :  { %s178_s9 = vpop.sfrf %177 }
  0xbe   :  { %p219_p0 = scmp.ne.s32.totalorder %s178_s9, 0 }
  0xc0   :  { %182 = shalt.err (%p219_p0)  }

</bundles_post_ra>
